<compile_context>
chip_gen: v7x
topology: tpu7x:2x2x1
jax: 0.10.0
libtpu: 0.0.40
codegen_flags: <defaults>
</compile_context>

<pallas_src>
import jax
import jax.numpy as jnp
from jax.experimental import pallas as pl
from jax.experimental.pallas import tpu as pltpu

LANE_CHOICES = (512, 256, 128)   # lane-dense last dims (multiples of 128)
SMOOTH = 1e-7


def _bce_terms(x, y):
    """Elementwise, numerically stable BCE-with-logits terms."""
    return jnp.maximum(x, 0.0) - x * y + jnp.log1p(jnp.exp(-jnp.abs(x)))


def _jax_partial_sums(x, y):
    """(bce_sum, intersection, pred_sum, target_sum) for a small remainder.

    Pure-JAX fused reduction -- used only for the < one-tile leftover and the
    sub-lane-row tail, so the extra HBM read is negligible."""
    x = x.reshape(-1).astype(jnp.float32)
    y = y.reshape(-1).astype(jnp.float32)
    p = jax.nn.sigmoid(x)
    return jnp.stack([jnp.sum(_bce_terms(x, y)), jnp.sum(p * y),
                      jnp.sum(p), jnp.sum(y)])


def _choose_layout(n):
    """Pick (lanes, rows, lane_tail) so flat->(rows, lanes) is a zero-copy
    bitcast reshape whenever possible (lane_tail == 0)."""
    for lanes in LANE_CHOICES:            # exact divisor -> bitcast reshape
        if n % lanes == 0 and n // lanes >= 8:
            return lanes, n // lanes, 0
    for lanes in LANE_CHOICES:            # rare fallback: prefix + tiny JAX tail
        if n // lanes >= 8:
            return lanes, n // lanes, n % lanes
    return LANE_CHOICES[-1], 0, n         # too small for a TPU tile: all-JAX


def _tile_byte_budget():
    """Per-input, per-pipeline-buffer tile bytes (2 inputs x 2 buffers live)."""
    try:
        kind = jax.devices()[0].device_kind.lower()
    except Exception:
        kind = ""
    if ("v6" in kind) or ("v7" in kind) or ("7x" in kind):
        return 4 << 20    # 16 MiB of double buffers: fits 32 MiB scoped VMEM
    return 2 << 20        # v5e (16 MiB default scoped VMEM) and unknown chips


def _slab_sum(v):
    """(r, lanes) -> (8, lanes) partial sums using sublane-aligned VPU adds."""
    r, c = v.shape
    return jnp.sum(v.reshape(r // 8, 8, c), axis=0)


def _seg_partials_kernel(seg_l_ref, seg_t_ref, acc_ref):
    i = pl.program_id(0)

    @pl.when(i == 0)
    def _init():
        acc_ref[...] = jnp.zeros_like(acc_ref)

    xs = seg_l_ref[...].astype(jnp.float32)
    ys = seg_t_ref[...].astype(jnp.float32)

    e = jnp.exp(-jnp.abs(xs))                       # one EUP exp per element
    bce = jnp.maximum(xs, 0.0) - xs * ys + jnp.log1p(e)
    inv = 1.0 / (1.0 + e)
    preds = jnp.where(xs >= 0.0, inv, e * inv)      # sigmoid(xs), reusing e

    acc_ref[0] += _slab_sum(bce)                    # sum of BCE terms (seg)
    acc_ref[1] += _slab_sum(preds * ys)             # dice intersection
    acc_ref[2] += _slab_sum(preds)                  # sum of sigmoid(logits_seg)
    acc_ref[3] += _slab_sum(ys)                     # sum of targets_seg


def bce_dice_with_reg_loss(logits_seg, logits_reg, targets_seg, targets_reg,
                           *, r_reg=0.5, alpha=0.5, max_block_rows=None):
    """logits_seg/targets_seg: NCHW tensors; logits_reg/targets_reg: (N, F)."""
    n_seg = logits_seg.size
    lanes, rows, lane_tail = _choose_layout(n_seg)

    seg_l_flat = logits_seg.reshape(-1)
    seg_t_flat = targets_seg.reshape(-1)

    partials = []   # list of (4,) f32 vectors: [bce, intersection, preds, targets]

    if rows > 0:
        if lane_tail == 0:
            # Zero-copy bitcast reshape of the original buffers (common case).
            seg_l2d = seg_l_flat.reshape(rows, lanes)
            seg_t2d = seg_t_flat.reshape(rows, lanes)
        else:
            # Rare: element count not divisible by 128 -> one prefix-slice copy.
            main = rows * lanes
            seg_l2d = seg_l_flat[:main].reshape(rows, lanes)
            seg_t2d = seg_t_flat[:main].reshape(rows, lanes)

        itemsize = max(seg_l2d.dtype.itemsize, seg_t2d.dtype.itemsize)
        target_rows = max(8, (_tile_byte_budget() // (itemsize * lanes)) // 8 * 8)
        if max_block_rows is not None:                 # test/tuning override
            target_rows = max(8, min(target_rows, (max_block_rows // 8) * 8))
        block_rows = max(8, (min(rows, target_rows) // 8) * 8)
        full_tiles = rows // block_rows
        rows_in_kernel = full_tiles * block_rows       # grid touches only these

        seg_spec = pl.BlockSpec((block_rows, lanes), lambda i: (i, 0))
        out_spec = pl.BlockSpec((4, 8, lanes), lambda i: (0, 0, 0))

        elems = rows_in_kernel * lanes
        cost = pl.CostEstimate(
            flops=int(12 * elems),
            transcendentals=int(2 * elems),
            bytes_accessed=int(elems * (seg_l2d.dtype.itemsize
                                        + seg_t2d.dtype.itemsize)
                               + 4 * 8 * lanes * 4))

        acc = pl.pallas_call(
            _seg_partials_kernel,
            out_shape=jax.ShapeDtypeStruct((4, 8, lanes), jnp.float32),
            grid=(full_tiles,),
            in_specs=[seg_spec, seg_spec],
            out_specs=out_spec,
            compiler_params=pltpu.CompilerParams(
                dimension_semantics=("arbitrary",)),
            cost_estimate=cost,
        )(seg_l2d, seg_t2d)
        partials.append(jnp.sum(acc, axis=(1, 2)))

        if rows_in_kernel < rows:   # leftover (< one tile of rows): fused JAX
            partials.append(_jax_partial_sums(seg_l2d[rows_in_kernel:],
                                              seg_t2d[rows_in_kernel:]))

    if lane_tail > 0 or rows == 0:  # sub-lane-row tail (or tiny all-JAX input)
        start = rows * lanes
        partials.append(_jax_partial_sums(seg_l_flat[start:],
                                          seg_t_flat[start:]))

    seg_sums = partials[0]
    for term in partials[1:]:
        seg_sums = seg_sums + term

    bce_seg_mean = seg_sums[0] / float(n_seg)
    dice_score = (2.0 * seg_sums[1] + SMOOTH) / (seg_sums[2] + seg_sums[3] + SMOOTH)
    seg_loss = alpha * bce_seg_mean + (1.0 - alpha) * (1.0 - dice_score)

    # Regression branch: tiny -> plain-JAX fused reduction (moved out of kernel).
    reg_loss = jnp.mean(_bce_terms(logits_reg.astype(jnp.float32),
                                   targets_reg.astype(jnp.float32)))
    return r_reg * reg_loss + (1.0 - r_reg) * seg_loss


if __name__ == "__main__":
    key = jax.random.PRNGKey(0)
    k1, k2, k3, k4 = jax.random.split(key, 4)

    # small shapes consistent with the module: seg NCHW, reg (N, F)
    logits_seg = jax.random.normal(k1, (2, 4, 16, 16), dtype=jnp.float32)
    targets_seg = jax.random.bernoulli(k2, 0.5, (2, 4, 16, 16)).astype(jnp.float32)
    logits_reg = jax.random.normal(k3, (2, 8), dtype=jnp.float32)
    targets_reg = jax.random.bernoulli(k4, 0.5, (2, 8)).astype(jnp.float32)

    loss = jax.jit(bce_dice_with_reg_loss)(logits_seg, logits_reg,
                                           targets_seg, targets_reg)
    jax.block_until_ready(loss)

    # plain-JAX reference (same math as the PyTorch module) for sanity
    def ref_loss(ls, lr, ts, tr):
        def bce(x, y):
            return jnp.mean(jnp.maximum(x, 0.0) - x * y
                            + jnp.log1p(jnp.exp(-jnp.abs(x))))
        p = jax.nn.sigmoid(ls).reshape(-1)
        t = ts.reshape(-1)
        d = (2.0 * jnp.sum(p * t) + 1e-7) / (jnp.sum(p) + jnp.sum(t) + 1e-7)
        seg = 0.5 * bce(ls, ts) + 0.5 * (1.0 - d)
        return 0.5 * bce(lr, tr) + 0.5 * seg

    ref = ref_loss(logits_seg, logits_reg, targets_seg, targets_reg)
    assert jnp.allclose(loss, ref, rtol=1e-5, atol=1e-6), (loss, ref)

    # second case: exercises multi-tile accumulation + leftover-rows epilogue
    k5, k6, k7, k8 = jax.random.split(jax.random.PRNGKey(1), 4)
    ls2 = jax.random.normal(k5, (2, 4, 33, 64), dtype=jnp.float32)
    ts2 = jax.random.bernoulli(k6, 0.5, (2, 4, 33, 64)).astype(jnp.float32)
    lr2 = jax.random.normal(k7, (2, 8), dtype=jnp.float32)
    tr2 = jax.random.bernoulli(k8, 0.5, (2, 8)).astype(jnp.float32)
    loss2 = jax.jit(lambda a, b, c, d: bce_dice_with_reg_loss(
        a, b, c, d, max_block_rows=16))(ls2, lr2, ts2, tr2)
    jax.block_until_ready(loss2)
    ref2 = ref_loss(ls2, lr2, ts2, tr2)
    assert jnp.allclose(loss2, ref2, rtol=1e-5, atol=1e-6), (loss2, ref2)

    print("KERNEL_OK")
</pallas_src>

<mosaic_0001>
module attributes {stable_mosaic.version = 11 : i64} {
  func.func @_seg_partials_kernel(%arg0: i32, %arg1: memref<8x256xf32, #tpu.memory_space<vmem>>, %arg2: memref<8x256xf32, #tpu.memory_space<vmem>>, %arg3: memref<4x8x256xf32, #tpu.memory_space<vmem>>) attributes {dimension_semantics = [#tpu.dimension_semantics<arbitrary>], iteration_bounds = array<i64: 1>, scalar_prefetch = 0 : i64, scratch_operands = 0 : i64, tpu.core_type = #tpu.core_type<tc>, window_params = [{transform_indices = @transform_0, window_bounds = array<i64: 8, 256>}, {transform_indices = @transform_1, window_bounds = array<i64: 8, 256>}, {pipeline_mode = #tpu.pipeline_mode<synchronous>, transform_indices = @transform_2, window_bounds = array<i64: 4, 8, 256>}]} {
    %c0_i32 = arith.constant 0 : i32
    %0 = arith.cmpi eq, %arg0, %c0_i32 : i32
    %1 = arith.extui %0 : i1 to i32
    %c0_i32_0 = arith.constant 0 : i32
    %2 = arith.cmpi ne, %1, %c0_i32_0 : i32
    scf.if %2 {
      %cst_33 = arith.constant 0.000000e+00 : f32
      %56 = vector.broadcast %cst_33 : f32 to vector<4x8x256xf32>
      %c0_34 = arith.constant 0 : index
      %c0_35 = arith.constant 0 : index
      %c0_36 = arith.constant 0 : index
      %57 = vector.load %arg3[%c0_34, %c0_35, %c0_36] : memref<4x8x256xf32, #tpu.memory_space<vmem>>, vector<4x8x256xf32>
      tpu.vector_store %arg3[%c0_34, %c0_35, %c0_36], %56 {strides = array<i32>} : memref<4x8x256xf32, #tpu.memory_space<vmem>>, vector<4x8x256xf32>,
    } else {
    }
    %c0 = arith.constant 0 : index
    %c0_1 = arith.constant 0 : index
    %3 = vector.load %arg1[%c0, %c0_1] : memref<8x256xf32, #tpu.memory_space<vmem>>, vector<8x256xf32>
    %c0_2 = arith.constant 0 : index
    %c0_3 = arith.constant 0 : index
    %4 = vector.load %arg2[%c0_2, %c0_3] : memref<8x256xf32, #tpu.memory_space<vmem>>, vector<8x256xf32>
    %5 = math.absf %3 : vector<8x256xf32>
    %cst = arith.constant 0.000000e+00 : f32
    %6 = vector.broadcast %cst : f32 to vector<8x256xf32>
    %7 = arith.subf %6, %5 : vector<8x256xf32>
    %8 = math.exp %7 : vector<8x256xf32>
    %cst_4 = arith.constant 0.000000e+00 : f32
    %9 = vector.broadcast %cst_4 : f32 to vector<8x256xf32>
    %10 = arith.maximumf %3, %9 : vector<8x256xf32>
    %11 = arith.mulf %3, %4 : vector<8x256xf32>
    %12 = arith.subf %10, %11 : vector<8x256xf32>
    %13 = math.log1p %8 : vector<8x256xf32>
    %14 = arith.addf %12, %13 : vector<8x256xf32>
    %cst_5 = arith.constant 1.000000e+00 : f32
    %15 = vector.broadcast %cst_5 : f32 to vector<8x256xf32>
    %16 = arith.addf %15, %8 : vector<8x256xf32>
    %cst_6 = arith.constant 1.000000e+00 : f32
    %17 = vector.broadcast %cst_6 : f32 to vector<8x256xf32>
    %18 = arith.divf %17, %16 : vector<8x256xf32>
    %cst_7 = arith.constant 0.000000e+00 : f32
    %19 = vector.broadcast %cst_7 : f32 to vector<8x256xf32>
    %20 = arith.cmpf oge, %3, %19 : vector<8x256xf32>
    %21 = arith.mulf %8, %18 : vector<8x256xf32>
    %22 = arith.select %20, %18, %21 : vector<8x256xi1>, vector<8x256xf32>
    %c0_8 = arith.constant 0 : index
    %c0_9 = arith.constant 0 : index
    %c0_10 = arith.constant 0 : index
    %23 = vector.load %arg3[%c0_8, %c0_9, %c0_10] : memref<4x8x256xf32, #tpu.memory_space<vmem>>, vector<1x8x256xf32>
    %24 = vector.shape_cast %23 : vector<1x8x256xf32> to vector<8x256xf32>
    %25 = vector.shape_cast %14 : vector<8x256xf32> to vector<1x8x256xf32>
    %cst_11 = arith.constant dense<0.000000e+00> : vector<8x256xf32>
    %26 = vector.multi_reduction <add>, %25, %cst_11 [0] : vector<1x8x256xf32> to vector<8x256xf32>
    %27 = arith.addf %24, %26 : vector<8x256xf32>
    %c0_12 = arith.constant 0 : index
    %c0_13 = arith.constant 0 : index
    %c0_14 = arith.constant 0 : index
    %28 = vector.load %arg3[%c0_12, %c0_13, %c0_14] : memref<4x8x256xf32, #tpu.memory_space<vmem>>, vector<1x8x256xf32>
    %29 = vector.shape_cast %28 : vector<1x8x256xf32> to vector<8x256xf32>
    %30 = vector.shape_cast %27 : vector<8x256xf32> to vector<1x8x256xf32>
    tpu.vector_store %arg3[%c0_12, %c0_13, %c0_14], %30 {strides = array<i32>} : memref<4x8x256xf32, #tpu.memory_space<vmem>>, vector<1x8x256xf32>,
    %c1 = arith.constant 1 : index
    %c0_15 = arith.constant 0 : index
    %c0_16 = arith.constant 0 : index
    %31 = vector.load %arg3[%c1, %c0_15, %c0_16] : memref<4x8x256xf32, #tpu.memory_space<vmem>>, vector<1x8x256xf32>
    %32 = vector.shape_cast %31 : vector<1x8x256xf32> to vector<8x256xf32>
    %33 = arith.mulf %22, %4 : vector<8x256xf32>
    %34 = vector.shape_cast %33 : vector<8x256xf32> to vector<1x8x256xf32>
    %cst_17 = arith.constant dense<0.000000e+00> : vector<8x256xf32>
    %35 = vector.multi_reduction <add>, %34, %cst_17 [0] : vector<1x8x256xf32> to vector<8x256xf32>
    %36 = arith.addf %32, %35 : vector<8x256xf32>
    %c1_18 = arith.constant 1 : index
    %c0_19 = arith.constant 0 : index
    %c0_20 = arith.constant 0 : index
    %37 = vector.load %arg3[%c1_18, %c0_19, %c0_20] : memref<4x8x256xf32, #tpu.memory_space<vmem>>, vector<1x8x256xf32>
    %38 = vector.shape_cast %37 : vector<1x8x256xf32> to vector<8x256xf32>
    %39 = vector.shape_cast %36 : vector<8x256xf32> to vector<1x8x256xf32>
    tpu.vector_store %arg3[%c1_18, %c0_19, %c0_20], %39 {strides = array<i32>} : memref<4x8x256xf32, #tpu.memory_space<vmem>>, vector<1x8x256xf32>,
    %c2 = arith.constant 2 : index
    %c0_21 = arith.constant 0 : index
    %c0_22 = arith.constant 0 : index
    %40 = vector.load %arg3[%c2, %c0_21, %c0_22] : memref<4x8x256xf32, #tpu.memory_space<vmem>>, vector<1x8x256xf32>
    %41 = vector.shape_cast %40 : vector<1x8x256xf32> to vector<8x256xf32>
    %42 = vector.shape_cast %22 : vector<8x256xf32> to vector<1x8x256xf32>
    %cst_23 = arith.constant dense<0.000000e+00> : vector<8x256xf32>
    %43 = vector.multi_reduction <add>, %42, %cst_23 [0] : vector<1x8x256xf32> to vector<8x256xf32>
    %44 = arith.addf %41, %43 : vector<8x256xf32>
    %c2_24 = arith.constant 2 : index
    %c0_25 = arith.constant 0 : index
    %c0_26 = arith.constant 0 : index
    %45 = vector.load %arg3[%c2_24, %c0_25, %c0_26] : memref<4x8x256xf32, #tpu.memory_space<vmem>>, vector<1x8x256xf32>
    %46 = vector.shape_cast %45 : vector<1x8x256xf32> to vector<8x256xf32>
    %47 = vector.shape_cast %44 : vector<8x256xf32> to vector<1x8x256xf32>
    tpu.vector_store %arg3[%c2_24, %c0_25, %c0_26], %47 {strides = array<i32>} : memref<4x8x256xf32, #tpu.memory_space<vmem>>, vector<1x8x256xf32>,
    %c3 = arith.constant 3 : index
    %c0_27 = arith.constant 0 : index
    %c0_28 = arith.constant 0 : index
    %48 = vector.load %arg3[%c3, %c0_27, %c0_28] : memref<4x8x256xf32, #tpu.memory_space<vmem>>, vector<1x8x256xf32>
    %49 = vector.shape_cast %48 : vector<1x8x256xf32> to vector<8x256xf32>
    %50 = vector.shape_cast %4 : vector<8x256xf32> to vector<1x8x256xf32>
    %cst_29 = arith.constant dense<0.000000e+00> : vector<8x256xf32>
    %51 = vector.multi_reduction <add>, %50, %cst_29 [0] : vector<1x8x256xf32> to vector<8x256xf32>
    %52 = arith.addf %49, %51 : vector<8x256xf32>
    %c3_30 = arith.constant 3 : index
    %c0_31 = arith.constant 0 : index
    %c0_32 = arith.constant 0 : index
    %53 = vector.load %arg3[%c3_30, %c0_31, %c0_32] : memref<4x8x256xf32, #tpu.memory_space<vmem>>, vector<1x8x256xf32>
    %54 = vector.shape_cast %53 : vector<1x8x256xf32> to vector<8x256xf32>
    %55 = vector.shape_cast %52 : vector<8x256xf32> to vector<1x8x256xf32>
    tpu.vector_store %arg3[%c3_30, %c0_31, %c0_32], %55 {strides = array<i32>} : memref<4x8x256xf32, #tpu.memory_space<vmem>>, vector<1x8x256xf32>,
    return
  }
  func.func @transform_0(%arg0: i32) -> (i32, i32) {
    %c0_i32 = arith.constant 0 : i32
    %c0_i32_0 = arith.constant 0 : i32
    return %arg0, %c0_i32 : i32, i32
  }
  func.func @transform_1(%arg0: i32) -> (i32, i32) {
    %c0_i32 = arith.constant 0 : i32
    %c0_i32_0 = arith.constant 0 : i32
    return %arg0, %c0_i32 : i32, i32
  }
  func.func @transform_2(%arg0: i32) -> (i32, i32, i32) {
    %c0_i32 = arith.constant 0 : i32
    %c0_i32_0 = arith.constant 0 : i32
    %c0_i32_1 = arith.constant 0 : i32
    %c0_i32_2 = arith.constant 0 : i32
    return %c0_i32, %c0_i32_0, %c0_i32_1 : i32, i32, i32
  }
}

</mosaic_0001>

<bundles_post_ra>
// kernel: bce_dice_with_reg_loss.1
= control target key start
LH: loop header
LB: loop body
LE: loop exit
PB: predicated region body
PF: predicated region fallthrough
CT: control target
= control target key end

     0   :  { %s190_s0 = inlined_call_operand.vmem [shape: f32[8,256], index: 0, kind: input, shape index: {}]   ;;  %s191_s1 = inlined_call_operand.vmem [shape: f32[8,256], index: 1, kind: input, shape index: {}]   ;;  %s192_s2 = inlined_call_operand.vmem [shape: f32[4,8,256], index: 2, kind: output, shape index: {}]  }
   0x1   :  { %v23_v0 = vld [vmem:[%s190_s0] sm:$0xff]  ;;  %v24_v1 = vld [vmem:[%s190_s0 + $0x8] sm:$0xff] }
   0x2   :  { %v27_v2 = vand.u32 2147483647, %v23_v0  ;;  %v28_v3 = vand.u32 2147483647, %v24_v1  ;;  %v25_v4 = vld [vmem:[%s191_s1] sm:$0xff]  ;;  %v26_v6 = vld [vmem:[%s191_s1 + $0x8] sm:$0xff] }
   0x3   :  { %124 = vst [vmem:[%s192_s2 + $0x30] sm:$0xff] %v25_v4  ;;  %125 = vst [vmem:[%s192_s2 + $0x38] sm:$0xff] %v26_v6  ;;  %v35_v17 = vmax.f32 %v23_v0, 0.0  ;;  %v37_v18 = vmul.f32 %v25_v4, %v23_v0  ;;  %v36_v21 = vmax.f32 %v24_v1, 0.0  ;;  %v38_v22 = vmul.f32 %v26_v6, %v24_v1 }
   0x4   :  { %v29_v5 = vsub.f32 0.0, %v27_v2  ;;  %v30_v7 = vsub.f32 0.0, %v28_v3  ;;  %vm67_vm1 = vcmp.ge.f32.partialorder %v23_v0, 0.0  ;;  %vm68_vm3 = vcmp.ge.f32.partialorder %v24_v1, 0.0 }
   0x5   :  { %v39_v26 = vsub.f32 %v35_v17, %v37_v18  ;;  %v40_v31 = vsub.f32 %v36_v21, %v38_v22 }
   0x6   :  { %v31_v8 = vmul.f32 1.442695, %v29_v5  ;;  %v33_v9 = vmul.f32 1.442695, %v30_v7 }
   0x8   :  { %127 = vpow2.f32 %v31_v8 }
   0x9   :  { %129 = vpow2.f32 %v33_v9 }
  0x12   :  { %v128_v10 = vpop.eup %127 }
  0x13   :  { %v130_v11 = vpop.eup %129  ;;  %v41_v12 = vadd.f32 1.0, %v128_v10  ;;  %v44_v14 = vmul.f32 -0.5, %v128_v10  ;;  %v47_v19 = vand.u32 2147483647, %v128_v10 }
  0x14   :  { %v50_v13 = vadd.f32 1.0, %v130_v11  ;;  %v53_v15 = vmul.f32 -0.5, %v130_v11  ;;  %v56_v23 = vand.u32 2147483647, %v130_v11 }
  0x15   :  { %131 = vlog2.f32 %v41_v12  ;;  %v45_v16 = vadd.f32 1.0, %v44_v14  ;;  %vm48_vm0 = vcmp.lt.f32.partialorder %v47_v19, 0.0004427343 }
  0x16   :  { %133 = vrcp.f32 %v41_v12  ;;  %v54_v20 = vadd.f32 1.0, %v53_v15  ;;  %vm57_vm2 = vcmp.lt.f32.partialorder %v56_v23, 0.0004427343 }
  0x17   :  { %135 = vlog2.f32 %v50_v13  ;;  %v46_v24 = vmul.f32 %v128_v10, %v45_v16 }
  0x18   :  { %137 = vrcp.f32 %v50_v13  ;;  %v55_v29 = vmul.f32 %v130_v11, %v54_v20 }
  0x1f   :  { %v132_v25 = vpop.eup %131 }
  0x20   :  { %v134_v27 = vpop.eup %133  ;;  %v43_v28 = vmul.f32 0.6931472, %v132_v25 }
  0x21   :  { %v136_v30 = vpop.eup %135  ;;  %v69_v32 = vmul.f32 %v134_v27, %v128_v10 }
  0x22   :  { %v138_v33 = vpop.eup %137  ;;  %v49_v34 = vsel %vm48_vm0, %v46_v24, %v43_v28  ;;  %v52_v35 = vmul.f32 0.6931472, %v136_v30 }
  0x23   :  { %v59_v36 = vadd.f32 %v49_v34, %v39_v26  ;;  %v71_v37 = vsel %vm67_vm1, %v134_v27, %v69_v32  ;;  %v70_v38 = vmul.f32 %v138_v33, %v130_v11 }
  0x24   :  { %v58_v39 = vsel %vm57_vm2, %v55_v29, %v52_v35  ;;  %v84_v40 = vmul.f32 %v71_v37, %v25_v4  ;;  %120 = vst [vmem:[%s192_s2 + $0x20] sm:$0xff] %v71_v37 }
  0x25   :  { %v60_v41 = vadd.f32 %v58_v39, %v40_v31  ;;  %v72_v42 = vsel %vm68_vm3, %v138_v33, %v70_v38  ;;  %79 = vst [vmem:[%s192_s2] sm:$0xff] %v59_v36 }
  0x26   :  { %v85_v43 = vmul.f32 %v72_v42, %v26_v6  ;;  %116 = vst [vmem:[%s192_s2 + $0x10] sm:$0xff] %v84_v40  ;;  %121 = vst [vmem:[%s192_s2 + $0x28] sm:$0xff] %v72_v42 }
  0x27   :  { %80 = vst [vmem:[%s192_s2 + $0x8] sm:$0xff] %v60_v41 }
  0x28   :  { %117 = vst [vmem:[%s192_s2 + $0x18] sm:$0xff] %v85_v43 }

</bundles_post_ra>
